<compile_context>
chip_gen: v6e
topology: v6e:2x2x1
jax: 0.10.0
libtpu: 0.0.40
codegen_flags: <defaults>
</compile_context>

<pallas_src>
import functools

import jax
import jax.numpy as jnp
from jax import lax
from jax.experimental import pallas as pl
from jax.experimental.pallas import tpu as pltpu


def _round_up(x, m):
    return (x + m - 1) // m * m


def _linear_stats_kernel(x_ref, w_ref, b_ref, y_ref, stats_ref, *, n_real, block_n):
    """Pass 1: y = x @ W + b (bf16 MXU, f32 acc) + sum / sumsq accumulation."""
    i = pl.program_id(0)

    @pl.when(i == 0)
    def _():
        stats_ref[...] = jnp.zeros_like(stats_ref)

    # bf16 x bf16 -> f32 on the MXU.
    y = jnp.dot(x_ref[...], w_ref[...], preferred_element_type=jnp.float32)
    y = y + b_ref[...]
    y_ref[...] = y

    # Mask padded batch rows out of the batch statistics.
    row = i * block_n + lax.broadcasted_iota(jnp.int32, (block_n, 1), 0)
    ym = jnp.where(row < n_real, y, jnp.float32(0.0))

    stats_ref[0:1, :] += jnp.sum(ym, axis=0, keepdims=True)
    stats_ref[1:2, :] += jnp.sum(ym * ym, axis=0, keepdims=True)

    # Finalize: convert (sum, sumsq) -> (mean, rstd) on the last grid step.
    @pl.when(i == pl.num_programs(0) - 1)
    def _():
        inv_n = jnp.float32(1.0 / n_real)  # precomputed 1/N, keeps finalize off VALU div
        mean = stats_ref[0:1, :] * inv_n
        var = jnp.maximum(stats_ref[1:2, :] * inv_n - mean * mean, jnp.float32(0.0))
        stats_ref[0:1, :] = mean
        stats_ref[1:2, :] = lax.rsqrt(var + jnp.float32(1e-5))


def _bn_relu_kernel(y_ref, stats_ref, gamma_ref, beta_ref, o_ref):
    """Pass 2: out = ReLU(gamma * (y - mean) * rstd + beta)."""
    mean = stats_ref[0:1, :]
    rstd = stats_ref[1:2, :]
    y = y_ref[...]
    o_ref[...] = jnp.maximum(
        gamma_ref[...] * ((y - mean) * rstd) + beta_ref[...], jnp.float32(0.0)
    )


def lbg_layer(x, weight, bias, gamma, beta, *, block_n=512):
    """LBG_layer forward.

    x:      (N, F_in)  float32
    weight: (F_out, F_in)   -- PyTorch nn.Linear layout
    bias, gamma, beta: (F_out,)
    Returns (N, F_out) float32.
    """
    n, f_in = x.shape
    f_out = weight.shape[0]

    # Lane-dense padding (multiples of 128) and batch-tile padding.
    f_in_p = _round_up(f_in, 128)
    f_out_p = _round_up(f_out, 128)
    block_n = _round_up(max(8, min(block_n, _round_up(n, 8))), 8)
    n_p = _round_up(n, block_n)
    grid_n = n_p // block_n

    # Pad + cast matmul operands to bf16 (f32 accumulation in-kernel).
    x_p = jnp.zeros((n_p, f_in_p), jnp.bfloat16).at[:n, :f_in].set(
        x.astype(jnp.bfloat16))
    w_p = jnp.zeros((f_in_p, f_out_p), jnp.bfloat16).at[:f_in, :f_out].set(
        weight.T.astype(jnp.bfloat16))
    b_p = jnp.zeros((1, f_out_p), jnp.float32).at[:, :f_out].set(
        bias.astype(jnp.float32)[None, :])
    g_p = jnp.zeros((1, f_out_p), jnp.float32).at[:, :f_out].set(
        gamma.astype(jnp.float32)[None, :])
    be_p = jnp.zeros((1, f_out_p), jnp.float32).at[:, :f_out].set(
        beta.astype(jnp.float32)[None, :])

    # Pass 1: tiled Linear + one-pass sum / sum-of-squares accumulation.
    y_p, stats = pl.pallas_call(
        functools.partial(_linear_stats_kernel, n_real=n, block_n=block_n),
        out_shape=(
            jax.ShapeDtypeStruct((n_p, f_out_p), jnp.float32),
            jax.ShapeDtypeStruct((2, f_out_p), jnp.float32),
        ),
        grid=(grid_n,),
        in_specs=[
            pl.BlockSpec((block_n, f_in_p), lambda i: (i, 0)),    # x tile
            pl.BlockSpec((f_in_p, f_out_p), lambda i: (0, 0)),    # W (resident)
            pl.BlockSpec((1, f_out_p), lambda i: (0, 0)),         # bias (resident)
        ],
        out_specs=(
            pl.BlockSpec((block_n, f_out_p), lambda i: (i, 0)),   # y tile
            pl.BlockSpec((2, f_out_p), lambda i: (0, 0)),         # stats accumulator
        ),
        compiler_params=pltpu.CompilerParams(
            dimension_semantics=("arbitrary",),   # accumulator carries across N tiles
            vmem_limit_bytes=32 * 1024 * 1024,
        ),
    )(x_p, w_p, b_p)

    # Pass 2: normalize + affine + ReLU, embarrassingly parallel over N tiles
    # (shards across TensorCores on v7x).
    out_p = pl.pallas_call(
        _bn_relu_kernel,
        out_shape=jax.ShapeDtypeStruct((n_p, f_out_p), jnp.float32),
        grid=(grid_n,),
        in_specs=[
            pl.BlockSpec((block_n, f_out_p), lambda i: (i, 0)),   # y tile
            pl.BlockSpec((2, f_out_p), lambda i: (0, 0)),         # mean / rstd
            pl.BlockSpec((1, f_out_p), lambda i: (0, 0)),         # gamma
            pl.BlockSpec((1, f_out_p), lambda i: (0, 0)),         # beta
        ],
        out_specs=pl.BlockSpec((block_n, f_out_p), lambda i: (i, 0)),
        compiler_params=pltpu.CompilerParams(
            dimension_semantics=("parallel",),
            vmem_limit_bytes=32 * 1024 * 1024,
        ),
    )(y_p, stats, g_p, be_p)

    return out_p[:n, :f_out]


if __name__ == "__main__":
    # Small but multi-tile demo shapes (N=300 -> 3 tiles of 128 with masking,
    # features get lane-padded to 128).
    in_feature, out_feature, batch = 64, 48, 300

    key = jax.random.PRNGKey(0)
    k_x, k_w, k_b = jax.random.split(key, 3)

    x = jax.random.normal(k_x, (batch, in_feature), dtype=jnp.float32)

    # PyTorch-like Linear init; BatchNorm1d default gamma=1, beta=0.
    bound = 1.0 / jnp.sqrt(jnp.float32(in_feature))
    weight = jax.random.uniform(
        k_w, (out_feature, in_feature), minval=-bound, maxval=bound, dtype=jnp.float32
    )
    bias = jax.random.uniform(
        k_b, (out_feature,), minval=-bound, maxval=bound, dtype=jnp.float32
    )
    gamma = jnp.ones((out_feature,), dtype=jnp.float32)
    beta = jnp.zeros((out_feature,), dtype=jnp.float32)

    out = lbg_layer(x, weight, bias, gamma, beta, block_n=128)
    jax.block_until_ready(out)
    assert out.shape == (batch, out_feature)

    # Pure-JAX reference with identical bf16-rounded matmul operands.
    x_r = x.astype(jnp.bfloat16).astype(jnp.float32)
    w_r = weight.astype(jnp.bfloat16).astype(jnp.float32)
    y_ref = x_r @ w_r.T + bias[None, :]
    m = jnp.mean(y_ref, axis=0, keepdims=True)
    v = jnp.mean((y_ref - m) ** 2, axis=0, keepdims=True)
    ref = jnp.maximum(
        gamma[None, :] * (y_ref - m) * lax.rsqrt(v + 1e-5) + beta[None, :], 0.0
    )
    max_err = float(jnp.max(jnp.abs(out - ref)))
    assert jnp.allclose(out, ref, atol=1e-2, rtol=1e-2), max_err

    print("KERNEL_OK")
</pallas_src>

<mosaic_0001>
module attributes {stable_mosaic.version = 11 : i64} {
  func.func @_linear_stats_kernel(%arg0: i32, %arg1: memref<128x128xbf16, #tpu.memory_space<vmem>>, %arg2: memref<128x128xbf16, #tpu.memory_space<vmem>>, %arg3: memref<1x128xf32, #tpu.memory_space<vmem>>, %arg4: memref<128x128xf32, #tpu.memory_space<vmem>>, %arg5: memref<2x128xf32, #tpu.memory_space<vmem>>) attributes {dimension_semantics = [#tpu.dimension_semantics<arbitrary>], iteration_bounds = array<i64: 3>, scalar_prefetch = 0 : i64, scratch_operands = 0 : i64, tpu.core_type = #tpu.core_type<tc>, window_params = [{transform_indices = @transform_0, window_bounds = array<i64: 128, 128>}, {pipeline_mode = #tpu.pipeline_mode<synchronous>, transform_indices = @transform_1, window_bounds = array<i64: 128, 128>}, {pipeline_mode = #tpu.pipeline_mode<synchronous>, transform_indices = @transform_2, window_bounds = array<i64: 1, 128>}, {transform_indices = @transform_3, window_bounds = array<i64: 128, 128>}, {pipeline_mode = #tpu.pipeline_mode<synchronous>, transform_indices = @transform_4, window_bounds = array<i64: 2, 128>}]} {
    %c0_i32 = arith.constant 0 : i32
    %0 = arith.cmpi eq, %arg0, %c0_i32 : i32
    %1 = arith.extui %0 : i1 to i32
    %c0_i32_0 = arith.constant 0 : i32
    %2 = arith.cmpi ne, %1, %c0_i32_0 : i32
    scf.if %2 {
      %cst_19 = arith.constant 0.000000e+00 : f32
      %34 = vector.broadcast %cst_19 : f32 to vector<2x128xf32>
      %c0_20 = arith.constant 0 : index
      %c0_21 = arith.constant 0 : index
      %35 = vector.load %arg5[%c0_20, %c0_21] : memref<2x128xf32, #tpu.memory_space<vmem>>, vector<2x128xf32>
      tpu.vector_store %arg5[%c0_20, %c0_21], %34 {strides = array<i32>} : memref<2x128xf32, #tpu.memory_space<vmem>>, vector<2x128xf32>,
    } else {
    }
    %c0 = arith.constant 0 : index
    %c0_1 = arith.constant 0 : index
    %3 = vector.load %arg1[%c0, %c0_1] : memref<128x128xbf16, #tpu.memory_space<vmem>>, vector<128x128xbf16>
    %c0_2 = arith.constant 0 : index
    %c0_3 = arith.constant 0 : index
    %4 = vector.load %arg2[%c0_2, %c0_3] : memref<128x128xbf16, #tpu.memory_space<vmem>>, vector<128x128xbf16>
    %cst = arith.constant dense<0.000000e+00> : vector<128x128xf32>
    %5 = tpu.matmul %3, %4, %cst {dimension_numbers = #tpu.dot_dimension_numbers<[1], [0], [0], [1], [0, 0, 1, 1], [], []>} : vector<128x128xbf16>, vector<128x128xbf16>, vector<128x128xf32> -> vector<128x128xf32>
    %c0_4 = arith.constant 0 : index
    %c0_5 = arith.constant 0 : index
    %6 = vector.load %arg3[%c0_4, %c0_5] : memref<1x128xf32, #tpu.memory_space<vmem>>, vector<1x128xf32>
    %7 = vector.broadcast %6 : vector<1x128xf32> to vector<128x128xf32>
    %8 = arith.addf %5, %7 : vector<128x128xf32>
    %c0_6 = arith.constant 0 : index
    %c0_7 = arith.constant 0 : index
    %9 = vector.load %arg4[%c0_6, %c0_7] : memref<128x128xf32, #tpu.memory_space<vmem>>, vector<128x128xf32>
    tpu.vector_store %arg4[%c0_6, %c0_7], %8 {strides = array<i32>} : memref<128x128xf32, #tpu.memory_space<vmem>>, vector<128x128xf32>,
    %c128_i32 = arith.constant 128 : i32
    %10 = arith.muli %arg0, %c128_i32 : i32
    %11 = tpu.iota {dimensions = array<i32: 0>} : vector<128x1xi32>
    %12 = vector.broadcast %10 : i32 to vector<128x1xi32>
    %13 = arith.addi %12, %11 : vector<128x1xi32>
    %c300_i32 = arith.constant 300 : i32
    %14 = vector.broadcast %c300_i32 : i32 to vector<128x1xi32>
    %15 = arith.cmpi slt, %13, %14 : vector<128x1xi32>
    %cst_8 = arith.constant 0.000000e+00 : f32
    %16 = vector.shape_cast %15 : vector<128x1xi1> to vector<128x1xi1>
    %17 = vector.broadcast %16 : vector<128x1xi1> to vector<128x128xi1>
    %18 = vector.broadcast %cst_8 : f32 to vector<128x128xf32>
    %19 = arith.select %17, %8, %18 : vector<128x128xi1>, vector<128x128xf32>
    %c0_9 = arith.constant 0 : index
    %c0_10 = arith.constant 0 : index
    %20 = vector.load %arg5[%c0_9, %c0_10] : memref<2x128xf32, #tpu.memory_space<vmem>>, vector<1x128xf32>
    %cst_11 = arith.constant dense<0.000000e+00> : vector<128xf32>
    %21 = vector.multi_reduction <add>, %19, %cst_11 [0] : vector<128x128xf32> to vector<128xf32>
    %22 = vector.shape_cast %21 : vector<128xf32> to vector<1x128xf32>
    %23 = arith.addf %20, %22 : vector<1x128xf32>
    %c0_12 = arith.constant 0 : index
    %c0_13 = arith.constant 0 : index
    %24 = vector.load %arg5[%c0_12, %c0_13] : memref<2x128xf32, #tpu.memory_space<vmem>>, vector<1x128xf32>
    tpu.vector_store %arg5[%c0_12, %c0_13], %23 {strides = array<i32>} : memref<2x128xf32, #tpu.memory_space<vmem>>, vector<1x128xf32>,
    %c1 = arith.constant 1 : index
    %c0_14 = arith.constant 0 : index
    %25 = vector.load %arg5[%c1, %c0_14] : memref<2x128xf32, #tpu.memory_space<vmem>>, vector<1x128xf32>
    %26 = arith.mulf %19, %19 : vector<128x128xf32>
    %cst_15 = arith.constant dense<0.000000e+00> : vector<128xf32>
    %27 = vector.multi_reduction <add>, %26, %cst_15 [0] : vector<128x128xf32> to vector<128xf32>
    %28 = vector.shape_cast %27 : vector<128xf32> to vector<1x128xf32>
    %29 = arith.addf %25, %28 : vector<1x128xf32>
    %c1_16 = arith.constant 1 : index
    %c0_17 = arith.constant 0 : index
    %30 = vector.load %arg5[%c1_16, %c0_17] : memref<2x128xf32, #tpu.memory_space<vmem>>, vector<1x128xf32>
    tpu.vector_store %arg5[%c1_16, %c0_17], %29 {strides = array<i32>} : memref<2x128xf32, #tpu.memory_space<vmem>>, vector<1x128xf32>,
    %c2_i32 = arith.constant 2 : i32
    %31 = arith.cmpi eq, %arg0, %c2_i32 : i32
    %32 = arith.extui %31 : i1 to i32
    %c0_i32_18 = arith.constant 0 : i32
    %33 = arith.cmpi ne, %32, %c0_i32_18 : i32
    scf.if %33 {
      %c0_19 = arith.constant 0 : index
      %c0_20 = arith.constant 0 : index
      %34 = vector.load %arg5[%c0_19, %c0_20] : memref<2x128xf32, #tpu.memory_space<vmem>>, vector<1x128xf32>
      %cst_21 = arith.constant 0.00333333341 : f32
      %35 = vector.broadcast %cst_21 : f32 to vector<1x128xf32>
      %36 = arith.mulf %34, %35 : vector<1x128xf32>
      %c1_22 = arith.constant 1 : index
      %c0_23 = arith.constant 0 : index
      %37 = vector.load %arg5[%c1_22, %c0_23] : memref<2x128xf32, #tpu.memory_space<vmem>>, vector<1x128xf32>
      %cst_24 = arith.constant 0.00333333341 : f32
      %38 = vector.broadcast %cst_24 : f32 to vector<1x128xf32>
      %39 = arith.mulf %37, %38 : vector<1x128xf32>
      %40 = arith.mulf %36, %36 : vector<1x128xf32>
      %41 = arith.subf %39, %40 : vector<1x128xf32>
      %cst_25 = arith.constant 0.000000e+00 : f32
      %42 = vector.broadcast %cst_25 : f32 to vector<1x128xf32>
      %43 = arith.maximumf %41, %42 : vector<1x128xf32>
      %c0_26 = arith.constant 0 : index
      %c0_27 = arith.constant 0 : index
      %44 = vector.load %arg5[%c0_26, %c0_27] : memref<2x128xf32, #tpu.memory_space<vmem>>, vector<1x128xf32>
      tpu.vector_store %arg5[%c0_26, %c0_27], %36 {strides = array<i32>} : memref<2x128xf32, #tpu.memory_space<vmem>>, vector<1x128xf32>,
      %cst_28 = arith.constant 9.99999974E-6 : f32
      %45 = vector.broadcast %cst_28 : f32 to vector<1x128xf32>
      %46 = arith.addf %43, %45 : vector<1x128xf32>
      %47 = math.rsqrt %46 : vector<1x128xf32>
      %c1_29 = arith.constant 1 : index
      %c0_30 = arith.constant 0 : index
      %48 = vector.load %arg5[%c1_29, %c0_30] : memref<2x128xf32, #tpu.memory_space<vmem>>, vector<1x128xf32>
      tpu.vector_store %arg5[%c1_29, %c0_30], %47 {strides = array<i32>} : memref<2x128xf32, #tpu.memory_space<vmem>>, vector<1x128xf32>,
    } else {
    }
    return
  }
  func.func @transform_0(%arg0: i32) -> (i32, i32) {
    %c0_i32 = arith.constant 0 : i32
    %c0_i32_0 = arith.constant 0 : i32
    return %arg0, %c0_i32 : i32, i32
  }
  func.func @transform_1(%arg0: i32) -> (i32, i32) {
    %c0_i32 = arith.constant 0 : i32
    %c0_i32_0 = arith.constant 0 : i32
    %c0_i32_1 = arith.constant 0 : i32
    return %c0_i32, %c0_i32_0 : i32, i32
  }
  func.func @transform_2(%arg0: i32) -> (i32, i32) {
    %c0_i32 = arith.constant 0 : i32
    %c0_i32_0 = arith.constant 0 : i32
    %c0_i32_1 = arith.constant 0 : i32
    return %c0_i32, %c0_i32_0 : i32, i32
  }
  func.func @transform_3(%arg0: i32) -> (i32, i32) {
    %c0_i32 = arith.constant 0 : i32
    %c0_i32_0 = arith.constant 0 : i32
    return %arg0, %c0_i32 : i32, i32
  }
  func.func @transform_4(%arg0: i32) -> (i32, i32) {
    %c0_i32 = arith.constant 0 : i32
    %c0_i32_0 = arith.constant 0 : i32
    %c0_i32_1 = arith.constant 0 : i32
    return %c0_i32, %c0_i32_0 : i32, i32
  }
}

</mosaic_0001>

<bundles_post_ra>
// kernel: tpu_custom_call.1
= control target key start
LH: loop header
LB: loop body
LE: loop exit
PB: predicated region body
PF: predicated region fallthrough
CT: control target
= control target key end

     0   :  { %10 = vsyncpa [#allocation3], 0  ;;  %s1483_s0 = inlined_call_operand.hbm [shape: bf16[384,128], index: 0, kind: input, shape index: {}]   ;;  %s1484_s1 = inlined_call_operand.hbm [shape: bf16[128,128], index: 1, kind: input, shape index: {}]   ;;  %s1485_s2 = inlined_call_operand.vmem [shape: f32[1,128], index: 2, kind: input, shape index: {}]   ;;  %s1486_s3 = inlined_call_operand.hbm [shape: f32[384,128], index: 3, kind: output, shape index: {0}]   ;;  %s1487_s4 = inlined_call_operand.hbm [shape: f32[2,128], index: 4, kind: output, shape index: {1}]  }
   0x1   :  { %12 = vsyncpa [#allocation3 + $0x1], 0 }
   0x2   :  { %13 = vsyncpa [#allocation6], 0 }
   0x3   :  { %14 = vsyncpa [#allocation4], 0 }
   0x4   :  { %16 = vsyncpa [#allocation4 + $0x1], 0 }
   0x5   :  { %17 = vsyncpa [#allocation9], 0  ;;  %s1160_s15 = smov 0   ;;  %s1162_s16 = smov 0  }
   0x6   :  { %s1164_s17 = smov 0   ;;  %s1166_s18 = smov 0  }
   0x7 LB: > { %s1181_s19 = sadd.s32 4294967295, %s1124_s18   ;;  %s783_s20 = sadd.s32 4294967294, %s1124_s18   ;;  %s1124_s18 = sphi %s1166_s18, %s1513_s18   ;;  %s1120_s17 = sphi %s1164_s17, %s1512_s17   ;;  %s1116_s16 = sphi %s1162_s16, %s1511_s16   ;;  %s1112_s15 = sphi %s1160_s15, %s1510_s15  }
   0x8   : > { %p43_p0 = scmp.ne.s32.totalorder %s1116_s16, %s1112_s15  ;;  %p1488_p1 = scmp.eq.s32.totalorder %s1181_s19, 0 }
   0x9   : > { %p115_p3 = scmp.eq.s32.totalorder %s783_s20, 2  ;;  %p784_p5 = scmp.ge.s32.totalorder %s1124_s18, 1 }
   0xa   : > { %p1190_p4 = por %p1488_p1, %p43_p0  ;;  %p143_p7 = scmp.lt.s32.totalorder %s1124_s18, 4 }
   0xb   : > { %p1195_p6 = por %p115_p3, %p43_p0  ;;  %s1126_s24 = smov [#allocation5]  }
   0xc   : > { %s1492_s21 = scalar_select %p1190_p4, 1, 0 }
   0xd   : > { %s1493_s22 = scalar_select %p1195_p6, 1, 0 }
   0xe   : > { %p1201_p9 = pnand %p784_p5, %p143_p7  ;;  %s155_s25 = sshll.u32 %s1126_s24, 4  ;;  %s156_s25 = int_to_ptr.vmem [resolvable:$true] %s155_s25 }
   0xf   : > { %s1214_s27 = sadd.s32 1, %s1124_s18   ;;  %s30_s28 = sadd.s32 1, %s1120_s17 }
  0x10   : > { %s1494_s23 = scalar_select %p1201_p9, 1, 0 }
  0x11   : > { %p899_p10 = pneg %p1201_p9  ;;  %s27_s29 = ssub.s32 %s1124_s18, %s1214_s27 }
  0x12   : > { %s985_s30 = scalar_lea.vmem %s156_s25, 1024  ;;  %p993_p5 = scmp.lt.s32.totalorder %s156_s25, %s156_s25 }
  0x13   : > { %p1209_p11 = pnand %p899_p10, %p1488_p1  ;;  %p986_p13 = scmp.ne.s32.totalorder %s156_s25, %s985_s30 }
  0x14   : > { %p994_p7 = scmp.lt.s32.totalorder %s985_s30, %s985_s30 }
  0x15   : > { %p976_p12 = pneg %p1209_p11 }
  0x16   : > { %p995_p8 = por %p994_p7, %p993_p5 }
  0x17   : > { %p988_p0 = pnand %p986_p13, %p976_p12 }
  0x19   : > { %p989_p3 = pneg %p988_p0 }
  0x1b   : > { %p996_p2 = pnand %p995_p8, %p989_p3 }
  0x1d   : > { %999 = shalt.err (!%p996_p2)
}
  0x1e   : > { %s1127_s5 = smov 64   ;;  %s1128_s6 = smov 4  }
  0x1f   : > { %902 = dma.hbm_to_vmem [thread:$0]  (!%p1209_p11), %s1484_s1, 1024, %s156_s25, [#allocation6], %s1127_s5, %s1127_s5, %s1128_s6  }
  0x20   : > { %p28_p2 = scmp.eq.s32.totalorder %s27_s29, 0  ;;  %p37_p8 = scmp.ne.s32.totalorder %s1120_s17, %s1116_s16 }
  0x21   : > { %p38_p10 = scmp.eq.s32.totalorder %s1124_s18, 0  ;;  %p912_p12 = scmp.lt.s32.totalorder %s1124_s18, 3 }
  0x22   : > { %s1234_s9 = scalar_select %p28_p2, %s1120_s17, %s30_s28  }
  0x23   : > { %p39_p13 = por %p38_p10, %p37_p8  ;;  %p1496_p0 = scmp.eq.s32.totalorder %s1181_s19, 2 }
  0x24   : > { %s172_s11 = sand.u32 1, %s1120_s17   ;;  %s821_s12 = sshll.u32 %s1124_s18, 10 }
  0x25   : > { %p1238_p3 = por %p1496_p0, %p37_p8  ;;  %s787_s13 = sshll.u32 %s172_s11, 6 }
  0x26   : > { %s1247_s24 = scalar_lea.hbm %s1483_s0, %s821_s12  ;;  %s176_s25 = scalar_lea.vmem [#allocation2], %s787_s13 }
  0x27   : > { %s1497_s10 = scalar_select %p1238_p3, 1, 0 }
  0x28   : > { %s183_s26 = sshll.u32 %s176_s25, 4  ;;  %p1249_p11 = pnand %p912_p12, %p39_p13  ;;  %s1253_s26 = int_to_ptr.vmem [resolvable:$true] %s183_s26 }
  0x29   : > { %s1255_s29 = scalar_lea.sflag [#allocation3], %s172_s11  ;;  %s1000_s30 = scalar_lea.hbm %s1247_s24, 1024 }
  0x2a   : > { %p1001_p5 = scmp.ne.s32.totalorder %s1247_s24, %s1000_s30  ;;  %p1002_p7 = pneg %p1249_p11 }
  0x2b   : > { %s1005_s12 = scalar_lea.hbm %s1483_s0, 3072  ;;  %p1006_p10 = scmp.lt.s32.totalorder %s1247_s24, %s1483_s0 }
  0x2c   : > { %p1003_p2 = pnand %p1002_p7, %p1001_p5  ;;  %p1007_p12 = scmp.lt.s32.totalorder %s1005_s12, %s1000_s30 }
  0x2e   : > { %p1004_p8 = pneg %p1003_p2  ;;  %p1008_p13 = por %p1007_p12, %p1006_p10 }
  0x30   : > { %p1009_p0 = pnand %p1008_p13, %p1004_p8 }
  0x32   : > { %1012 = shalt.err (!%p1009_p0)
}
  0x33   : > { %s1013_s11 = scalar_lea.vmem %s1253_s26, 1024  ;;  %s1129_s20 = smov [#allocation2]  }
  0x34   : > { %p1014_p1 = scmp.ne.s32.totalorder %s1253_s26, %s1013_s11  ;;  %s1018_s25 = sshll.u32 %s1129_s20, 4  ;;  %s1019_s25 = int_to_ptr.vmem [resolvable:$false] %s1018_s25 }
  0x35   : > { %s1020_s7 = scalar_lea.vmem %s1019_s25, 2048  ;;  %p1021_p2 = scmp.lt.s32.totalorder %s1253_s26, %s1019_s25 }
  0x36   : > { %p1016_p6 = pnand %p1014_p1, %p1002_p7  ;;  %p1022_p3 = scmp.lt.s32.totalorder %s1020_s7, %s1013_s11 }
  0x38   : > { %p1017_p5 = pneg %p1016_p6  ;;  %p1023_p4 = por %p1022_p3, %p1021_p2 }
  0x3a   : > { %p1024_p9 = pnand %p1023_p4, %p1017_p5 }
  0x3c   : > { %1027 = shalt.err (!%p1024_p9)
}
  0x3d   : > { %906 = dma.hbm_to_vmem [thread:$0]  (!%p1249_p11), %s1247_s24, 1024, %s1253_s26, %s1255_s29, %s1127_s5, %s1127_s5, %s1128_s6  }
  0x3e   : > { %p1499_p1 = scmp.ne.s32.totalorder %s1494_s23, 0 }
  0x3f   : > { %s1282_s30 = sand.u32 (!%p1499_p1), 1, %s1116_s16   ;;  %p1500_p4 = scmp.ne.s32.totalorder (!%p1499_p1), %s1492_s21, 0 }
  0x40   : > { %195 = sbr.rel (%p1499_p1) target bundleno = 438 (0x1b6), region = 32  ;;  %s791_s8 = sshll.u32 (!%p1499_p1), %s1282_s30, 6 }
  0x41   : > { %s198_s12 = scalar_lea.sflag (!%p1499_p1), [#allocation3], %s1282_s30  ;;  %s1286_s13 = scalar_lea.vmem (!%p1499_p1), [#allocation2], %s791_s8 }
  0x45   : > { %1095 = dma.done.wait (%p1500_p4), %s198_s12, 1024  }
  0x46   : > { %1097 = vsyncadd (%p1500_p4), %s198_s12, 4294966272  ;;  %p1501_p6 = scmp.eq.s32.totalorder %s1181_s19, 0 }
  0x48   : > { %1099 = dma.done.wait (%p1501_p6), [#allocation6], 1024   ;;  %p1502_p9 = pmov %p1501_p6 }
  0x49   : > { %s793_s23 = sshll.u32 %s1282_s30, 7  ;;  %p1503_p3 = scmp.ne.s32.totalorder %s1181_s19, 0 }
  0x4a   : > { %1101 = vsyncadd (%p1502_p9), [#allocation6], 4294966272  ;;  %s1297_s5 = scalar_lea.vmem [#allocation7], %s793_s23 }
  0x4b   : > { %236 = sbr.rel (%p1503_p3) target bundleno = 82 (0x52), region = 44 }
  0x50   : > { %v1130_v0 = vmov 0.0  }
  0x51   : > { %237 = vst [vmem:[#allocation8] sm:$0x3] %v1130_v0 }
  0x52 PF: > { %v956_v1 = vld [vmem:[#allocation5 + $0x38] sm:$0xff]   ;;  %v957_v2 = vld [vmem:[#allocation5 + $0x30] sm:$0xff]   ;;  %v958_v3 = vld [vmem:[#allocation5 + $0x28] sm:$0xff]   ;;  %v487_v17 = vlaneseq  ;;  %s812_s21 = sshll.u32 %s1181_s19, 7  ;;  %p813_p11 = scmp.ne.s32.totalorder %s1181_s19, 2 }
  0x53   : > { %839 = vmatprep.subr.bf16.mxu0 %v956_v1  ;;  %871 = vmatprep.subr.bf16.mxu1 %v956_v1  ;;  %v959_v4 = vld [vmem:[#allocation5 + $0x20] sm:$0xff]   ;;  %v960_v6 = vld [vmem:[#allocation5 + $0x18] sm:$0xff]   ;;  %v961_v8 = vld [vmem:[#allocation5 + $0x10] sm:$0xff]   ;;  %v1319_v22 = vstv %s812_s21 }
  0x54   : > { %840 = vmatpush3.bf16.msra.mxu0 %v956_v1  ;;  %879 = vmatpush3.bf16.msra.mxu1 %v956_v1  ;;  %v964_v5 = vld [vmem:[%s1286_s13] sm:$0xff]   ;;  %v962_v9 = vld [vmem:[#allocation5 + $0x8] sm:$0xff]   ;;  %v966_v13 = vld [vmem:[%s1286_s13 + $0x10] sm:$0xff]   ;;  %v1309_v18 = vshrl.u32 %v487_v17, 7 }
  0x55   : > { %841 = vmatprep.subr.bf16.mxu0 %v957_v2  ;;  %872 = vmatprep.subr.bf16.mxu1 %v957_v2  ;;  %v968_v7 = vld [vmem:[%s1286_s13 + $0x20] sm:$0xff]   ;;  %v965_v11 = vld [vmem:[%s1286_s13 + $0x8] sm:$0xff]   ;;  %v970_v14 = vld [vmem:[%s1286_s13 + $0x30] sm:$0xff]  }
  0x56   : > { %855 = vmatprep.mubr.bf16.mxu0 %v964_v5  ;;  %863 = vmatprep.mubr.bf16.mxu1 %v968_v7  ;;  %v963_v10 = vld [vmem:[#allocation5] sm:$0xff]   ;;  %v969_v12 = vld [vmem:[%s1286_s13 + $0x28] sm:$0xff]   ;;  %v967_v15 = vld [vmem:[%s1286_s13 + $0x18] sm:$0xff]   ;;  %v490_v20 = vadd.s32 16, %v1309_v18  ;;  %v489_v21 = vadd.s32 8, %v1309_v18  ;;  %v491_v23 = vadd.s32 24, %v1309_v18  ;;  %v505_v25 = vadd.s32 %v1319_v22, %v1309_v18 }
  0x57   : > { %v971_v16 = vld [vmem:[%s1286_s13 + $0x38] sm:$0xff]   ;;  %v1315_v19 = vld [vmem:[%s1485_s2] ss:$0 sm:$0xff]  ;;  %v494_v26 = vadd.s32 48, %v1309_v18  ;;  %v492_v27 = vadd.s32 32, %v1309_v18  ;;  %v495_v41 = vadd.s32 56, %v1309_v18 }
  0x58   : > { %842 = vmatpush3.bf16.msra.mxu0 %v957_v2  ;;  %880 = vmatpush3.bf16.msra.mxu1 %v957_v2  ;;  %v507_v31 = vadd.s32 %v1319_v22, %v490_v20  ;;  %v506_v33 = vadd.s32 %v1319_v22, %v489_v21  ;;  %v508_v36 = vadd.s32 %v1319_v22, %v491_v23  ;;  %vm521_vm0 = vcmp.lt.s32.totalorder %v505_v25, 300 }
  0x59   : > { %843 = vmatprep.subr.bf16.mxu0 %v958_v3  ;;  %873 = vmatprep.subr.bf16.mxu1 %v958_v3  ;;  %v1341_v39 = vadd.s32 %v1319_v22, %v494_v26  ;;  %v509_v40 = vadd.s32 %v1319_v22, %v492_v27  ;;  %v493_v46 = vadd.s32 40, %v1309_v18  ;;  %v512_v52 = vadd.s32 %v1319_v22, %v495_v41 }
  0x5a   : > { %vm523_vm1 = vcmp.lt.s32.totalorder %v507_v31, 300  ;;  %vm522_vm2 = vcmp.lt.s32.totalorder %v506_v33, 300  ;;  %vm524_vm3 = vcmp.lt.s32.totalorder %v508_v36, 300  ;;  %v496_v53 = vadd.s32 64, %v1309_v18 }
  0x5b   : > { %vm527_vm4 = vcmp.lt.s32.totalorder %v1341_v39, 300  ;;  %vm525_vm5 = vcmp.lt.s32.totalorder %v509_v40, 300  ;;  %v510_v63 = vadd.s32 %v1319_v22, %v493_v46  ;;  %vm528_vm7 = vcmp.lt.s32.totalorder %v512_v52, 300 }
  0x5c   : > { %844 = vmatpush3.bf16.msra.mxu0 %v958_v3  ;;  %881 = vmatpush3.bf16.msra.mxu1 %v958_v3  ;;  %v497_v3 = vadd.s32 72, %v1309_v18  ;;  %v502_v46 = vadd.s32 112, %v1309_v18 }
  0x5d   : > { %845 = vmatprep.subr.bf16.mxu0 %v959_v4  ;;  %874 = vmatprep.subr.bf16.mxu1 %v959_v4  ;;  %vm526_vm6 = vcmp.lt.s32.totalorder %v510_v63, 300 }
  0x5e   : > { %v514_v25 = vadd.s32 %v1319_v22, %v497_v3 }
  0x60   : > { %846 = vmatpush3.bf16.msra.mxu0 %v959_v4  ;;  %882 = vmatpush3.bf16.msra.mxu1 %v959_v4  ;;  %vm530_vm9 = vcmp.lt.s32.totalorder %v514_v25, 300 }
  0x61   : > { %847 = vmatprep.subr.bf16.mxu0 %v960_v6  ;;  %875 = vmatprep.subr.bf16.mxu1 %v960_v6 }
  0x64   : > { %848 = vmatpush3.bf16.msra.mxu0 %v960_v6  ;;  %883 = vmatpush3.bf16.msra.mxu1 %v960_v6 }
  0x65   : > { %849 = vmatprep.subr.bf16.mxu0 %v961_v8  ;;  %876 = vmatprep.subr.bf16.mxu1 %v961_v8 }
  0x68   : > { %850 = vmatpush3.bf16.msra.mxu0 %v961_v8  ;;  %884 = vmatpush3.bf16.msra.mxu1 %v961_v8  ;;  %v498_v8 = vadd.s32 80, %v1309_v18 }
  0x69   : > { %851 = vmatprep.subr.bf16.mxu0 %v962_v9  ;;  %877 = vmatprep.subr.bf16.mxu1 %v962_v9 }
  0x6c   : > { %852 = vmatpush3.bf16.msra.mxu0 %v962_v9  ;;  %885 = vmatpush3.bf16.msra.mxu1 %v962_v9 }
  0x6d   : > { %853 = vmatprep.subr.bf16.mxu0 %v963_v10  ;;  %878 = vmatprep.subr.bf16.mxu1 %v963_v10 }
  0x70   : > { %854 = vmatpush3.bf16.msra.mxu0 %v963_v10  ;;  %886 = vmatpush3.bf16.msra.mxu1 %v963_v10 }
  0x73   : > { %856 = vmatmul.mubr.bf16.vlgmr.msra.gmra.mxu0 %v965_v11  ;;  %864 = vmatmul.mubr.bf16.vlgmr.msra.gmra.mxu1 %v969_v12 }
  0x74   : > { %859 = vmatprep.mubr.bf16.mxu0 %v966_v13  ;;  %867 = vmatprep.mubr.bf16.mxu1 %v970_v14  ;;  %v513_v13 = vadd.s32 %v1319_v22, %v496_v53  ;;  %v503_v53 = vadd.s32 120, %v1309_v18 }
  0x76   : > { %vm529_vm8 = vcmp.lt.s32.totalorder %v513_v13, 300 }
  0x7b   : > { %860 = vmatmul.mubr.bf16.gmra.mxu0 %v967_v15  ;;  %868 = vmatmul.mubr.bf16.gmra.mxu1 %v971_v16 }
 0x133   : > { %v857_v24 = vpop.f32.mrf.mxu0  ;;  %v865_v28 = vpop.f32.mrf.mxu1 }
 0x134   : > { %v416_v29 = vadd.f32 %v857_v24, %v1315_v19  ;;  %v1328_v30 = vadd.f32 %v865_v28, %v1315_v19  ;;  %v499_v24 = vadd.s32 88, %v1309_v18 }
 0x135   : > { %v407_v32 = vpop.f32.mrf.mxu0  ;;  %v439_v34 = vpop.f32.mrf.mxu1 }
 0x136   : > { %472 = vst [vmem:[%s1297_s5 + $0x10] sm:$0xff] %v416_v29  ;;  %v408_v35 = vadd.f32 %v1315_v19, %v407_v32  ;;  %480 = vst [vmem:[%s1297_s5 + $0x50] sm:$0xff] %v1328_v30  ;;  %v1338_v37 = vadd.f32 %v1315_v19, %v439_v34  ;;  %v571_v55 = vsel %vm523_vm1, %v416_v29, 0.0  ;;  %v515_v32 = vadd.s32 %v1319_v22, %v498_v8 }
 0x137   : > { %v858_v38 = vpop.f32.mrf.mxu0  ;;  %v866_v42 = vpop.f32.mrf.mxu1  ;;  %v612_v5 = vmul.f32 %v571_v55, %v571_v55  ;;  %v516_v40 = vadd.s32 %v1319_v22, %v499_v24 }
 0x138   : > { %470 = vst [vmem:[%s1297_s5] sm:$0xff] %v408_v35  ;;  %v419_v43 = vadd.f32 %v858_v38, %v1315_v19  ;;  %478 = vst [vmem:[%s1297_s5 + $0x40] sm:$0xff] %v1338_v37  ;;  %v1350_v44 = vadd.f32 %v866_v42, %v1315_v19  ;;  %v569_v48 = vsel %vm521_vm0, %v408_v35, 0.0  ;;  %v500_v38 = vadd.s32 96, %v1309_v18 }
 0x139   : > { %v410_v45 = vpop.f32.mrf.mxu0  ;;  %v442_v47 = vpop.f32.mrf.mxu1  ;;  %v610_v59 = vmul.f32 %v569_v48, %v569_v48  ;;  %vm531_vm10 = vcmp.lt.s32.totalorder %v515_v32, 300  ;;  %vm532_vm11 = vcmp.lt.s32.totalorder %v516_v40, 300  ;;  %v585_v32 = vld [vmem:[#allocation8] sm:$0x1] }
 0x13a   : > { %473 = vst [vmem:[%s1297_s5 + $0x18] sm:$0xff] %v419_v43  ;;  %v411_v49 = vadd.f32 %v1315_v19, %v410_v45  ;;  %481 = vst [vmem:[%s1297_s5 + $0x58] sm:$0xff] %v1350_v44  ;;  %v1358_v50 = vadd.f32 %v1315_v19, %v442_v47  ;;  %v572_v1 = vsel %vm524_vm3, %v419_v43, 0.0  ;;  %v501_v43 = vadd.s32 104, %v1309_v18 }
 0x13b   : > { %v861_v51 = vpop.f32.mrf.mxu0  ;;  %v869_v54 = vpop.f32.mrf.mxu1  ;;  %v613_v15 = vmul.f32 %v572_v1, %v572_v1  ;;  %v577_v45 = vsel %vm529_vm8, %v1338_v37, 0.0  ;;  %v519_v37 = vadd.s32 %v1319_v22, %v502_v46  ;;  %v580_v63 = vsel %vm532_vm11, %v1350_v44, 0.0 }
 0x13c   : > { %471 = vst [vmem:[%s1297_s5 + $0x8] sm:$0xff] %v411_v49  ;;  %v570_v56 = vsel %vm522_vm2, %v411_v49, 0.0  ;;  %v432_v57 = vadd.f32 %v861_v51, %v1315_v19  ;;  %479 = vst [vmem:[%s1297_s5 + $0x48] sm:$0xff] %v1358_v50  ;;  %v1370_v58 = vadd.f32 %v869_v54, %v1315_v19  ;;  %v517_v51 = vadd.s32 %v1319_v22, %v500_v38 }
 0x13d   : > { %v586_v60 = vadd.f32 %v570_v56, %v569_v48  ;;  %v611_v61 = vmul.f32 %v570_v56, %v570_v56  ;;  %v423_v62 = vpop.f32.mrf.mxu0  ;;  %v455_v0 = vpop.f32.mrf.mxu1  ;;  %v578_v52 = vsel %vm530_vm9, %v1358_v50, 0.0  ;;  %v618_v54 = vmul.f32 %v577_v45, %v577_v45 }
 0x13e   : > { %476 = vst [vmem:[%s1297_s5 + $0x30] sm:$0xff] %v432_v57  ;;  %v424_v2 = vadd.f32 %v1315_v19, %v423_v62  ;;  %484 = vst [vmem:[%s1297_s5 + $0x70] sm:$0xff] %v1370_v58  ;;  %v1380_v4 = vadd.f32 %v1315_v19, %v455_v0  ;;  %v575_v31 = vsel %vm527_vm4, %v432_v57, 0.0  ;;  %v518_v57 = vadd.s32 %v1319_v22, %v501_v43 }
 0x13f   : > { %v587_v6 = vadd.f32 %v586_v60, %v571_v55  ;;  %v626_v7 = vadd.f32 %v611_v61, %v610_v59  ;;  %v862_v9 = vpop.f32.mrf.mxu0  ;;  %v870_v10 = vpop.f32.mrf.mxu1  ;;  %v616_v41 = vmul.f32 %v575_v31, %v575_v31  ;;  %v579_v59 = vsel %vm531_vm10, %v1328_v30, 0.0 }
 0x140   : > { %474 = vst [vmem:[%s1297_s5 + $0x20] sm:$0xff] %v424_v2  ;;  %v573_v11 = vsel %vm525_vm5, %v424_v2, 0.0  ;;  %v435_v12 = vadd.f32 %v862_v9, %v1315_v19  ;;  %482 = vst [vmem:[%s1297_s5 + $0x60] sm:$0xff] %v1380_v4  ;;  %v1390_v14 = vadd.f32 %v870_v10, %v1315_v19  ;;  %v619_v61 = vmul.f32 %v578_v52, %v578_v52 }
 0x141   : > { %v627_v16 = vadd.f32 %v626_v7, %v612_v5  ;;  %v588_v17 = vadd.f32 %v587_v6, %v572_v1  ;;  %v426_v20 = vpop.f32.mrf.mxu0  ;;  %v458_v21 = vpop.f32.mrf.mxu1  ;;  %v614_v28 = vmul.f32 %v573_v11, %v573_v11  ;;  %vm533_vm12 = vcmp.lt.s32.totalorder %v517_v51, 300 }
 0x142   : > { %477 = vst [vmem:[%s1297_s5 + $0x38] sm:$0xff] %v435_v12  ;;  %v427_v23 = vadd.f32 %v1315_v19, %v426_v20  ;;  %485 = vst [vmem:[%s1297_s5 + $0x78] sm:$0xff] %v1390_v14  ;;  %v459_v26 = vadd.f32 %v1315_v19, %v458_v21  ;;  %v576_v19 = vsel %vm528_vm7, %v435_v12, 0.0  ;;  %v520_v0 = vadd.s32 %v1319_v22, %v503_v53 }
 0x143   : > { %v589_v27 = vadd.f32 %v588_v17, %v573_v11  ;;  %v628_v29 = vadd.f32 %v627_v16, %v613_v15  ;;  %v617_v47 = vmul.f32 %v576_v19, %v576_v19  ;;  %v620_v50 = vmul.f32 %v579_v59, %v579_v59 }
 0x144   : > { %475 = vst [vmem:[%s1297_s5 + $0x28] sm:$0xff] %v427_v23  ;;  %v574_v33 = vsel %vm526_vm6, %v427_v23, 0.0  ;;  %483 = vst [vmem:[%s1297_s5 + $0x68] sm:$0xff] %v459_v26  ;;  %vm534_vm13 = vcmp.lt.s32.totalorder %v518_v57, 300  ;;  %v581_v2 = vsel %vm533_vm12, %v1380_v4, 0.0  ;;  %v621_v3 = vmul.f32 %v580_v63, %v580_v63 }
 0x145   : > { %v629_v34 = vadd.f32 %v628_v29, %v614_v28  ;;  %v590_v35 = vadd.f32 %v589_v27, %v574_v33  ;;  %v615_v36 = vmul.f32 %v574_v33, %v574_v33  ;;  %vm535_vm14 = vcmp.lt.s32.totalorder %v519_v37, 300 }
 0x146   : > { %v582_v6 = vsel %vm534_vm13, %v459_v26, 0.0  ;;  %v622_v8 = vmul.f32 %v581_v2, %v581_v2  ;;  %vm536_vm15 = vcmp.lt.s32.totalorder %v520_v0, 300  ;;  %v583_v10 = vsel %vm535_vm14, %v1370_v58, 0.0 }
 0x147   : > { %v591_v42 = vadd.f32 %v590_v35, %v575_v31  ;;  %v630_v39 = vadd.f32 %v629_v34, %v615_v36  ;;  %v623_v22 = vmul.f32 %v582_v6, %v582_v6  ;;  %v584_v12 = vsel %vm536_vm15, %v1390_v14, 0.0  ;;  %v609_v14 = vld [vmem:[#allocation8 + $0x1] sm:$0x1] }
 0x148   : > { %v624_v13 = vmul.f32 %v583_v10, %v583_v10  ;;  %v625_v4 = vmul.f32 %v584_v12, %v584_v12 }
 0x149   : > { %v631_v48 = vadd.f32 %v630_v39, %v616_v41  ;;  %v592_v49 = vadd.f32 %v591_v42, %v576_v19 }
 0x14b   : > { %v593_v55 = vadd.f32 %v592_v49, %v577_v45  ;;  %v632_v56 = vadd.f32 %v631_v48, %v617_v47 }
 0x14d   : > { %v594_v60 = vadd.f32 %v593_v55, %v578_v52  ;;  %v633_v62 = vadd.f32 %v632_v56, %v618_v54 }
 0x14f   : > { %v595_v1 = vadd.f32 %v594_v60, %v579_v59  ;;  %v634_v18 = vadd.f32 %v633_v62, %v619_v61 }
 0x151   : > { %v635_v5 = vadd.f32 %v634_v18, %v620_v50  ;;  %v596_v30 = vadd.f32 %v595_v1, %v580_v63 }
 0x153   : > { %v597_v7 = vadd.f32 %v596_v30, %v581_v2  ;;  %v636_v9 = vadd.f32 %v635_v5, %v621_v3 }
 0x155   : > { %v637_v44 = vadd.f32 %v636_v9, %v622_v8  ;;  %v598_v11 = vadd.f32 %v597_v7, %v582_v6 }
 0x157   : > { %v599_v15 = vadd.f32 %v598_v11, %v583_v10  ;;  %v638_v16 = vadd.f32 %v637_v44, %v623_v22 }
 0x159   : > { %v600_v17 = vadd.f32 %v599_v15, %v584_v12  ;;  %v639_v20 = vadd.f32 %v638_v16, %v624_v13 }
 0x15b   : > { %v601_v21 = vrot.slane %v600_v17, 4  ;;  %v640_v23 = vadd.f32 %v639_v20, %v625_v4 }
 0x15d   : > { %v602_v24 = vadd.f32 %v601_v21, %v600_v17  ;;  %v641_v25 = vrot.slane %v640_v23, 4 }
 0x15f   : > { %v603_v26 = vrot.slane %v602_v24, 2  ;;  %v642_v27 = vadd.f32 %v641_v25, %v640_v23 }
 0x161   : > { %v604_v28 = vadd.f32 %v603_v26, %v602_v24  ;;  %v643_v29 = vrot.slane %v642_v27, 2 }
 0x163   : > { %v605_v58 = vrot.slane %v604_v28, 1  ;;  %v644_v31 = vadd.f32 %v643_v29, %v642_v27 }
 0x165   : > { %v606_v33 = vadd.f32 %v605_v58, %v604_v28  ;;  %v645_v34 = vrot.slane %v644_v31, 1 }
 0x167   : > { %v607_v35 = vadd.f32 %v606_v33, %v585_v32  ;;  %v646_v36 = vadd.f32 %v645_v34, %v644_v31  ;;  %652 = sbr.rel (%p813_p11) target bundleno = 394 (0x18a), region = 48 }
 0x169   : > { %608 = vst [vmem:[#allocation8] sm:$0x1] %v607_v35  ;;  %v647_v38 = vadd.f32 %v646_v36, %v609_v14 }
 0x16b   : > { %648 = vst [vmem:[#allocation8 + $0x1] sm:$0x1] %v647_v38 }
 0x170   : > { %v653_v19 = vld [vmem:[#allocation8] sm:$0x1] }
 0x171   : > { %v654_v41 = vmul.f32 0.0033333334, %v653_v19 }
 0x172   : > { %v655_v40 = vld [vmem:[#allocation8 + $0x1] sm:$0x1] }
 0x173   : > { %v656_v42 = vmul.f32 0.0033333334, %v655_v40  ;;  %v657_v39 = vmul.f32 %v654_v41, %v654_v41  ;;  %660 = vst [vmem:[#allocation8] sm:$0x1] %v654_v41 }
 0x175   : > { %v658_v43 = vsub.f32 %v656_v42, %v657_v39 }
 0x177   : > { %v659_v45 = vmax.f32 %v658_v43, 0.0 }
 0x179   : > { %v661_v46 = vadd.f32 1e-05, %v659_v45 }
 0x17b   : > { %972 = vrsqrt.f32 %v661_v46 }
 0x188   : > { %v973_v47 = vpop.eup %972 }
 0x189   : > { %663 = vst [vmem:[#allocation8 + $0x1] sm:$0x1] %v973_v47 }
 0x18a PF: > { %s822_s26 = sshll.u32 %s1181_s19, 11  ;;  %s678_s11 = sshll.u32 %s1297_s5, 4  ;;  %s1430_s11 = int_to_ptr.vmem [resolvable:$true] %s678_s11 }
 0x18b   : > { %s1427_s14 = scalar_lea.hbm %s1486_s3, %s822_s26  ;;  %s665_s20 = scalar_lea.sflag [#allocation4], %s1282_s30 }
 0x18c   : > { %s1028_s25 = scalar_lea.vmem %s1430_s11, 2048  ;;  %p1504_p8 = scmp.ne.s32.totalorder %s1497_s10, 0 }
 0x18d   : > { %p1029_p7 = scmp.ne.s32.totalorder %s1430_s11, %s1028_s25  ;;  %s1131_s7 = smov [#allocation7]  }
 0x18e   : > { %s1032_s8 = sshll.u32 %s1131_s7, 4  ;;  %s1033_s8 = int_to_ptr.vmem [resolvable:$false] %s1032_s8 }
 0x18f   : > { %p1030_p10 = pnand %p1029_p7, %p1504_p8  ;;  %s1034_s12 = scalar_lea.vmem %s1033_s8, 4096 }
 0x190   : > { %p1035_p13 = scmp.lt.s32.totalorder %s1430_s11, %s1033_s8  ;;  %p1036_p0 = scmp.lt.s32.totalorder %s1034_s12, %s1028_s25 }
 0x191   : > { %p1031_p12 = pneg %p1030_p10 }
 0x192   : > { %p1037_p5 = por %p1036_p0, %p1035_p13 }
 0x194   : > { %p1038_p2 = pnand %p1037_p5, %p1031_p12 }
 0x196   : > { %1041 = shalt.err (!%p1038_p2)
}
 0x197   : > { %s1042_s13 = scalar_lea.hbm %s1427_s14, 2048  ;;  %s1046_s21 = scalar_lea.hbm %s1486_s3, 6144 }
 0x198   : > { %p1043_p1 = scmp.ne.s32.totalorder %s1427_s14, %s1042_s13  ;;  %p1047_p9 = scmp.lt.s32.totalorder %s1427_s14, %s1486_s3 }
 0x199   : > { %p1048_p3 = scmp.lt.s32.totalorder %s1046_s21, %s1042_s13 }
 0x19a   : > { %p1044_p4 = pnand %p1043_p1, %p1504_p8 }
 0x19b   : > { %p1049_p11 = por %p1048_p3, %p1047_p9 }
 0x19c   : > { %p1045_p6 = pneg %p1044_p4 }
 0x19e   : > { %p1050_p7 = pnand %p1049_p11, %p1045_p6 }
 0x1a0   : > { %1053 = shalt.err (!%p1050_p7)
}
 0x1a1   : > { %s1132_s26 = smov 128   ;;  %s1133_s28 = smov 8  }
 0x1a2   : > { %893 = dma.vmem_to_hbm [thread:$0]  (%p1504_p8), %s1430_s11, 2048, %s1427_s14, %s665_s20, %s1132_s26, %s1132_s26, %s1133_s28  }
 0x1a3   : > { %s1134_s29 = smov [#allocation8]   ;;  %p1505_p12 = scmp.eq.s32.totalorder %s1181_s19, 2 }
 0x1a4   : > { %s692_s25 = sshll.u32 %s1134_s29, 4  ;;  %s693_s25 = int_to_ptr.vmem [resolvable:$true] %s692_s25 }
 0x1a5   : > { %s1054_s7 = scalar_lea.vmem %s693_s25, 32  ;;  %p1061_p5 = scmp.lt.s32.totalorder %s693_s25, %s693_s25 }
 0x1a6   : > { %p1055_p10 = scmp.ne.s32.totalorder %s693_s25, %s1054_s7  ;;  %p1062_p2 = scmp.lt.s32.totalorder %s1054_s7, %s1054_s7 }
 0x1a8   : > { %p1056_p13 = pnand %p1055_p10, %p1505_p12  ;;  %p1063_p1 = por %p1062_p2, %p1061_p5 }
 0x1aa   : > { %p1057_p0 = pneg %p1056_p13 }
 0x1ac   : > { %p1064_p4 = pnand %p1063_p1, %p1057_p0 }
 0x1ae   : > { %1067 = shalt.err (!%p1064_p4)
}
 0x1af   : > { %p1506_p6 = pmov %p1505_p12 }
 0x1b1   : > { %895 = dma.vmem_to_hbm [thread:$0]  (%p1506_p6), %s693_s25, 32, %s1487_s4, [#allocation9]  }
 0x1b2   : > { %p1507_p8 = pmov %p1506_p6 }
 0x1b3   : > { %p1508_p9 = pmov %p1506_p6 }
 0x1b4   : > { %1103 = dma.done.wait (%p1507_p8), [#allocation9], 32  }
 0x1b5   : > { %1105 = vsyncadd (%p1508_p9), [#allocation9], 4294967264 }
 0x1b6 PF: > { %p916_p3 = scmp.ge.s32.totalorder %s1124_s18, 2  ;;  %s708_s10 = sand.u32 1, %s1112_s15  }
 0x1b7   : > { %p1509_p11 = scmp.ne.s32.totalorder %s1493_s22, 0  ;;  %s709_s30 = scalar_lea.sflag [#allocation4], %s708_s10 }
 0x1b9   : > { %p908_p7 = pnand %p916_p3, %p1509_p11 }
 0x1bb   : > { %p909_p10 = pneg %p908_p7 }
 0x1bd   : > { %1107 = dma.done.wait (%p909_p10), %s709_s30, 2048  }
 0x1be   : > { %1109 = vsyncadd (%p909_p10), %s709_s30, 4294965248  ;;  %p20_p12 = scmp.ge.s32.totalorder %s1214_s27, 5   ;;  %s1510_s15 = smov %s1116_s16 }
 0x1bf   : > { %s1511_s16 = smov %s1120_s17  ;;  %s1512_s17 = smov %s1234_s9 }
 0x1c0   : > { %s1513_s18 = smov %s1214_s27  ;;  %22 = sbr.rel (!%p20_p12) target bundleno = 7 (0x7), region = 97 }
 0x1c5   :  { %714 = vsyncpa [#allocation3], 1 }
 0x1c6   :  { %716 = vsyncpa [#allocation3 + $0x1], 1 }
 0x1c7   :  { %717 = vsyncpa [#allocation6], 1 }
 0x1c8   :  { %718 = vsyncpa [#allocation4], 1 }
 0x1c9   :  { %720 = vsyncpa [#allocation4 + $0x1], 1 }
 0x1ca   :  { %721 = vsyncpa [#allocation9], 1 }

</bundles_post_ra>
